<compile_context>
chip_gen: v5e
topology: v5e:2x2
jax: 0.10.0
libtpu: 0.0.40
codegen_flags: <defaults>
</compile_context>

<pallas_src>
import jax
import jax.numpy as jnp
from jax.experimental import pallas as pl
from jax.experimental.pallas import tpu as pltpu


# ---- packed parameter slab ([112, 32] f32), transposed orientation -----------
# Every tensor starts on an 8-row boundary in the orientation read by the kernel:
#   rows   0:16 , cols 0:4   -> W1^T [16, 4]    (Linear 4  -> 16)
#   rows  16:48 , cols 0:16  -> W2^T [32, 16]   (Linear 16 -> 32)
#   rows  48:50 , cols 0:32  -> Wh^T [2, 32]    (row 48 = mean head, 49 = std head)
#   rows  56:72 , col  0     -> b1   [16, 1]
#   rows  72:104, col  0     -> b2   [32, 1]
#   rows 104:106, col  0     -> bh   [2, 1]
_SLAB_ROWS = 112
_SLAB_COLS = 32


def policy_network_kernel(x_ref, p_ref, out_ref):
    # Batch-on-lanes layout: x block is [4, TB] (lane-dense), activations are
    # [16, TB] / [32, TB] / [2, TB]; the output block [2, TB] is a lane-dense store.
    x = x_ref[...]                                   # [4, TB] f32

    # Static, sublane-aligned slices into the resident parameter slab.
    w1t = p_ref[0:16, 0:4]                           # [16, 4]
    w2t = p_ref[16:48, 0:16]                         # [32, 16]
    wht = p_ref[48:50, 0:32]                         # [2, 32]  fused mean/std heads
    b1 = p_ref[56:72, 0:1]                           # [16, 1]
    b2 = p_ref[72:104, 0:1]                          # [32, 1]
    bh = p_ref[104:106, 0:1]                         # [2, 1]

    # shared_net: Linear(4,16) -> tanh -> Linear(16,32) -> tanh
    h1 = jnp.tanh(jnp.dot(w1t, x, preferred_element_type=jnp.float32) + b1)   # [16, TB]
    h2 = jnp.tanh(jnp.dot(w2t, h1, preferred_element_type=jnp.float32) + b2)  # [32, TB]

    # Fused heads: one matmul -> [2, TB] (row 0 = mean pre-act, row 1 = std pre-act).
    heads = jnp.dot(wht, h2, preferred_element_type=jnp.float32) + bh         # [2, TB]

    mean = heads[0:1, :]                             # [1, TB]
    s = heads[1:2, :]                                # [1, TB]
    # Numerically stable softplus, applied only to the std row.
    std = jnp.maximum(s, 0.0) + jnp.log1p(jnp.exp(-jnp.abs(s)))

    out_ref[0:1, :] = mean.astype(out_ref.dtype)
    out_ref[1:2, :] = std.astype(out_ref.dtype)


def pack_params(params):
    """Pack all weights/biases (transposed orientation) into one [112, 32] f32 slab."""
    slab = jnp.zeros((_SLAB_ROWS, _SLAB_COLS), jnp.float32)
    slab = slab.at[0:16, 0:4].set(params["w1"].T.astype(jnp.float32))     # [16, 4]
    slab = slab.at[16:48, 0:16].set(params["w2"].T.astype(jnp.float32))   # [32, 16]
    slab = slab.at[48:49, 0:32].set(params["wm"].T.astype(jnp.float32))   # [1, 32]
    slab = slab.at[49:50, 0:32].set(params["ws"].T.astype(jnp.float32))   # [1, 32]
    slab = slab.at[56:72, 0:1].set(params["b1"].T.astype(jnp.float32))    # [16, 1]
    slab = slab.at[72:104, 0:1].set(params["b2"].T.astype(jnp.float32))   # [32, 1]
    slab = slab.at[104:105, 0:1].set(params["bm"].T.astype(jnp.float32))  # [1, 1]
    slab = slab.at[105:106, 0:1].set(params["bs"].T.astype(jnp.float32))  # [1, 1]
    return slab


def _round_up(n, m):
    return ((n + m - 1) // m) * m


def policy_network_forward(x, params, *, tb_max=32768):
    """x: [B, obs_dims] float32. Returns (action_means [B,1], action_stddevs [B,1])."""
    B, obs_dims = x.shape
    x_t = jnp.transpose(x.astype(jnp.float32))        # [obs_dims, B]; cheap layout plumbing
    slab = pack_params(params)

    if B <= 256:
        # Tiny batch: one block whose shape equals the full arrays
        # (no 128-multiple requirement, no padding).
        TB = B
    else:
        # Lane-aligned tiles (multiple of 128), at least 2 grid steps so the
        # "parallel" batch axis can shard across both v7x TensorCores; capped so
        # the double-buffered working set stays well inside scoped VMEM everywhere.
        TB = min(tb_max, _round_up(pl.cdiv(B, 2), 128))
    # Ragged last block is fine: OOB reads feed lanes that are discarded,
    # OOB writes are dropped by Pallas — no wrapper-side padding pass.
    grid = (pl.cdiv(B, TB),)

    out = pl.pallas_call(
        policy_network_kernel,
        out_shape=jax.ShapeDtypeStruct((2, B), jnp.float32),
        grid=grid,
        in_specs=[
            pl.BlockSpec((obs_dims, TB), lambda i: (0, i)),             # x streamed, batch on lanes
            pl.BlockSpec((_SLAB_ROWS, _SLAB_COLS), lambda i: (0, 0)),   # params resident
        ],
        out_specs=pl.BlockSpec((2, TB), lambda i: (0, i)),              # lane-dense [2, B] output
        compiler_params=pltpu.CompilerParams(
            dimension_semantics=("parallel",),
            vmem_limit_bytes=32 * 1024 * 1024,   # headroom for big tiles; safe on v5e/v6e/v7x
        ),
    )(x_t, slab)

    action_means = jnp.transpose(out[0:1, :])          # [B, 1]
    action_stddevs = jnp.transpose(out[1:2, :])        # [B, 1]
    return action_means, action_stddevs


def init_params(key, obs_space_dims=4, h1=16, h2=32):
    """PyTorch-Linear-style U(-1/sqrt(fan_in), +1/sqrt(fan_in)) init.

    Weights stored as [in, out]; biases as [1, out].
    """
    ks = jax.random.split(key, 8)

    def linear(kw, kb, fan_in, fan_out):
        bound = 1.0 / jnp.sqrt(jnp.float32(fan_in))
        w = jax.random.uniform(kw, (fan_in, fan_out), jnp.float32, -bound, bound)
        b = jax.random.uniform(kb, (1, fan_out), jnp.float32, -bound, bound)
        return w, b

    w1, b1 = linear(ks[0], ks[1], obs_space_dims, h1)
    w2, b2 = linear(ks[2], ks[3], h1, h2)
    wm, bm = linear(ks[4], ks[5], h2, 1)
    ws, bs = linear(ks[6], ks[7], h2, 1)
    return {"w1": w1, "b1": b1, "w2": w2, "b2": b2,
            "wm": wm, "bm": bm, "ws": ws, "bs": bs}


def reference_forward(x, p):
    """Pure-JAX reference of the PyTorch forward (stable softplus)."""
    h1 = jnp.tanh(x @ p["w1"] + p["b1"])
    h2 = jnp.tanh(h1 @ p["w2"] + p["b2"])
    mean = h2 @ p["wm"] + p["bm"]
    s = h2 @ p["ws"] + p["bs"]
    std = jnp.maximum(s, 0.0) + jnp.log1p(jnp.exp(-jnp.abs(s)))
    return mean, std


if __name__ == "__main__":
    key = jax.random.PRNGKey(0)
    k_params, k_x, k_x2 = jax.random.split(key, 3)

    obs_space_dims = 4   # CartPole-v1 observation space
    batch = 8            # small batch of observations

    params = init_params(k_params, obs_space_dims=obs_space_dims)
    x = jax.random.normal(k_x, (batch, obs_space_dims), dtype=jnp.float32)

    action_means, action_stddevs = policy_network_forward(x, params)
    jax.block_until_ready((action_means, action_stddevs))

    ref_means, ref_stddevs = reference_forward(x, params)
    assert action_means.shape == (batch, 1)
    assert action_stddevs.shape == (batch, 1)
    assert jnp.allclose(action_means, ref_means, atol=1e-5, rtol=1e-5)
    assert jnp.allclose(action_stddevs, ref_stddevs, atol=1e-5, rtol=1e-5)
    assert bool(jnp.all(action_stddevs > 0))

    # Also exercise the tiled (grid) path: non-multiple batch -> 2 grid steps,
    # ragged last block handled without any wrapper-side padding.
    x_big = jax.random.normal(k_x2, (600, obs_space_dims), dtype=jnp.float32)
    m_big, s_big = policy_network_forward(x_big, params)
    jax.block_until_ready((m_big, s_big))
    rm_big, rs_big = reference_forward(x_big, params)
    assert m_big.shape == (600, 1) and s_big.shape == (600, 1)
    assert jnp.allclose(m_big, rm_big, atol=1e-5, rtol=1e-5)
    assert jnp.allclose(s_big, rs_big, atol=1e-5, rtol=1e-5)
    assert bool(jnp.all(s_big > 0))

    print("KERNEL_OK")
</pallas_src>

<mosaic_0001>
module attributes {stable_mosaic.version = 11 : i64} {
  func.func @policy_network_kernel(%arg0: i32, %arg1: memref<4x8xf32, #tpu.memory_space<vmem>>, %arg2: memref<112x32xf32, #tpu.memory_space<vmem>>, %arg3: memref<2x8xf32, #tpu.memory_space<vmem>>) attributes {dimension_semantics = [#tpu.dimension_semantics<parallel>], iteration_bounds = array<i64: 1>, scalar_prefetch = 0 : i64, scratch_operands = 0 : i64, tpu.core_type = #tpu.core_type<tc>, window_params = [{transform_indices = @transform_0, window_bounds = array<i64: 4, 8>}, {pipeline_mode = #tpu.pipeline_mode<synchronous>, transform_indices = @transform_1, window_bounds = array<i64: 112, 32>}, {transform_indices = @transform_2, window_bounds = array<i64: 2, 8>}]} {
    %c0 = arith.constant 0 : index
    %c0_0 = arith.constant 0 : index
    %0 = vector.load %arg1[%c0, %c0_0] : memref<4x8xf32, #tpu.memory_space<vmem>>, vector<4x8xf32>
    %c0_1 = arith.constant 0 : index
    %c0_2 = arith.constant 0 : index
    %1 = vector.load %arg2[%c0_1, %c0_2] : memref<112x32xf32, #tpu.memory_space<vmem>>, vector<16x4xf32>
    %c16 = arith.constant 16 : index
    %c0_3 = arith.constant 0 : index
    %2 = vector.load %arg2[%c16, %c0_3] : memref<112x32xf32, #tpu.memory_space<vmem>>, vector<32x16xf32>
    %c48 = arith.constant 48 : index
    %c0_4 = arith.constant 0 : index
    %3 = vector.load %arg2[%c48, %c0_4] : memref<112x32xf32, #tpu.memory_space<vmem>>, vector<2x32xf32>
    %c56 = arith.constant 56 : index
    %c0_5 = arith.constant 0 : index
    %4 = vector.load %arg2[%c56, %c0_5] : memref<112x32xf32, #tpu.memory_space<vmem>>, vector<16x1xf32>
    %c72 = arith.constant 72 : index
    %c0_6 = arith.constant 0 : index
    %5 = vector.load %arg2[%c72, %c0_6] : memref<112x32xf32, #tpu.memory_space<vmem>>, vector<32x1xf32>
    %c104 = arith.constant 104 : index
    %c0_7 = arith.constant 0 : index
    %6 = vector.load %arg2[%c104, %c0_7] : memref<112x32xf32, #tpu.memory_space<vmem>>, vector<2x1xf32>
    %cst = arith.constant dense<0.000000e+00> : vector<16x8xf32>
    %7 = tpu.matmul %1, %0, %cst {dimension_numbers = #tpu.dot_dimension_numbers<[1], [0], [0], [1], [0, 0, 1, 1], [], []>} : vector<16x4xf32>, vector<4x8xf32>, vector<16x8xf32> -> vector<16x8xf32>
    %8 = vector.broadcast %4 : vector<16x1xf32> to vector<16x8xf32>
    %9 = arith.addf %7, %8 : vector<16x8xf32>
    %10 = math.tanh %9 : vector<16x8xf32>
    %cst_8 = arith.constant dense<0.000000e+00> : vector<32x8xf32>
    %11 = tpu.matmul %2, %10, %cst_8 {dimension_numbers = #tpu.dot_dimension_numbers<[1], [0], [0], [1], [0, 0, 1, 1], [], []>} : vector<32x16xf32>, vector<16x8xf32>, vector<32x8xf32> -> vector<32x8xf32>
    %12 = vector.broadcast %5 : vector<32x1xf32> to vector<32x8xf32>
    %13 = arith.addf %11, %12 : vector<32x8xf32>
    %14 = math.tanh %13 : vector<32x8xf32>
    %cst_9 = arith.constant dense<0.000000e+00> : vector<2x8xf32>
    %15 = tpu.matmul %3, %14, %cst_9 {dimension_numbers = #tpu.dot_dimension_numbers<[1], [0], [0], [1], [0, 0, 1, 1], [], []>} : vector<2x32xf32>, vector<32x8xf32>, vector<2x8xf32> -> vector<2x8xf32>
    %16 = vector.broadcast %6 : vector<2x1xf32> to vector<2x8xf32>
    %17 = arith.addf %15, %16 : vector<2x8xf32>
    %18 = vector.extract_strided_slice %17 {offsets = [0, 0], sizes = [1, 8], strides = [1, 1]} : vector<2x8xf32> to vector<1x8xf32>
    %19 = vector.extract_strided_slice %17 {offsets = [1, 0], sizes = [1, 8], strides = [1, 1]} : vector<2x8xf32> to vector<1x8xf32>
    %cst_10 = arith.constant 0.000000e+00 : f32
    %20 = vector.broadcast %cst_10 : f32 to vector<1x8xf32>
    %21 = arith.maximumf %19, %20 : vector<1x8xf32>
    %22 = math.absf %19 : vector<1x8xf32>
    %cst_11 = arith.constant 0.000000e+00 : f32
    %23 = vector.broadcast %cst_11 : f32 to vector<1x8xf32>
    %24 = arith.subf %23, %22 : vector<1x8xf32>
    %25 = math.exp %24 : vector<1x8xf32>
    %26 = math.log1p %25 : vector<1x8xf32>
    %27 = arith.addf %21, %26 : vector<1x8xf32>
    %c0_12 = arith.constant 0 : index
    %c0_13 = arith.constant 0 : index
    %28 = vector.load %arg3[%c0_12, %c0_13] : memref<2x8xf32, #tpu.memory_space<vmem>>, vector<1x8xf32>
    tpu.vector_store %arg3[%c0_12, %c0_13], %18 {strides = array<i32>} : memref<2x8xf32, #tpu.memory_space<vmem>>, vector<1x8xf32>,
    %c1 = arith.constant 1 : index
    %c0_14 = arith.constant 0 : index
    %29 = vector.load %arg3[%c1, %c0_14] : memref<2x8xf32, #tpu.memory_space<vmem>>, vector<1x8xf32>
    tpu.vector_store %arg3[%c1, %c0_14], %27 {strides = array<i32>} : memref<2x8xf32, #tpu.memory_space<vmem>>, vector<1x8xf32>,
    return
  }
  func.func @transform_0(%arg0: i32) -> (i32, i32) {
    %c0_i32 = arith.constant 0 : i32
    %c0_i32_0 = arith.constant 0 : i32
    return %c0_i32, %arg0 : i32, i32
  }
  func.func @transform_1(%arg0: i32) -> (i32, i32) {
    %c0_i32 = arith.constant 0 : i32
    %c0_i32_0 = arith.constant 0 : i32
    %c0_i32_1 = arith.constant 0 : i32
    return %c0_i32, %c0_i32_0 : i32, i32
  }
  func.func @transform_2(%arg0: i32) -> (i32, i32) {
    %c0_i32 = arith.constant 0 : i32
    %c0_i32_0 = arith.constant 0 : i32
    return %c0_i32, %arg0 : i32, i32
  }
}

</mosaic_0001>

<bundles_post_ra>
// kernel: tpu_custom_call.1
= control target key start
LH: loop header
LB: loop body
LE: loop exit
PB: predicated region body
PF: predicated region fallthrough
CT: control target
= control target key end

     0   :  { %vm44_vm0 = vcmask 1043456   ;;  %v260_v3 = vmov 0   ;;  %vm37_vm1 = vcmask 31744   ;;  %s325_s0 = inlined_call_operand.vmem [shape: f32[4,8], index: 0, kind: input, shape index: {}]   ;;  %s326_s1 = inlined_call_operand.vmem [shape: f32[112,32], index: 1, kind: input, shape index: {}]   ;;  %s327_s2 = inlined_call_operand.hbm [shape: f32[2,8], index: 2, kind: output, shape index: {}]  }
   0x1   :  { %v12_v0 = vld [vmem:[%s325_s0] sm:$0xf]  ;;  %215 = vset.pattern.permute.xlu0 %v260_v3 }
   0x2   :  { %v21_v1 = vld [vmem:[%s326_s1 + $0x40] sm:$0xff]  ;;  %203 = vmatpush.msk.msra.mxu0 %vm44_vm0, %v12_v0 }
   0x3   :  { %v13_v2 = vld [vmem:[%s326_s1] sm:$0xff]  ;;  %34 = vperm.xlu0 %215, %v21_v1  }
   0x4   :  { %204 = vmatmul.msk.f32.vlgmr.msra.gmra.mxu0 %vm37_vm1, %v13_v2 }
   0x5   :  { %7 = vsyncpa [#allocation3], 0  ;;  %216 = vset.pattern.permute.xlu1 %v260_v3  ;;  %217 = vset.pattern.permute.xlu2 %v260_v3  ;;  %v20_v4 = vld [vmem:[%s326_s1 + $0x38] sm:$0xff]  ;;  %v14_v5 = vld [vmem:[%s326_s1 + $0x8] sm:$0xff]  ;;  %vm93_vm2 = vcmask 130048   ;;  %vm144_vm3 = vcmask 261120  }
   0x6   :  { %v26_v6 = vld [vmem:[%s326_s1 + $0x68] sm:$0x3]  ;;  %v25_v7 = vld [vmem:[%s326_s1 + $0x60] sm:$0xff]  ;;  %v23_v9 = vld [vmem:[%s326_s1 + $0x50] sm:$0xff]  ;;  %vm183_vm4 = vcmask 57344   ;;  %s194_s13 = sshll.u32 %s327_s2, 4  ;;  %s195_s13 = int_to_ptr.hbm [resolvable:$true] %s194_s13 }
   0x7   :  { %90 = vperm.xlu1 %216, %v25_v7   ;;  %80 = vperm.xlu2 %217, %v23_v9   ;;  %v24_v11 = vld [vmem:[%s326_s1 + $0x58] sm:$0xff]  ;;  %v22_v12 = vld [vmem:[%s326_s1 + $0x48] sm:$0xff]  ;;  %v17_v18 = vld [vmem:[%s326_s1 + $0x20] sm:$0xff]  ;;  %vm185_vm6 = vcmask 58369  }
   0x8   :  { %v15_v19 = vld [vmem:[%s326_s1 + $0x10] sm:$0xff]  ;;  %v18_v21 = vld [vmem:[%s326_s1 + $0x28] sm:$0xff]  ;;  %v16_v22 = vld [vmem:[%s326_s1 + $0x18] sm:$0xff] }
   0x9   :  { %v19_v38 = vld [vmem:[%s326_s1 + $0x30] sm:$0x3]  ;;  %s261_s1 = smov [#allocation2]  }
   0xa   :  { %s192_s10 = sshll.u32 %s261_s1, 4  ;;  %s193_s10 = int_to_ptr.vmem [resolvable:$true] %s192_s10 }
   0xb   :  { %29 = vperm.xlu0 %215, %v20_v4  }
   0xc   :  { %205 = vmatmul.msk.f32.gmra.mxu0 %vm37_vm1, %v14_v5 }
   0xf   :  { %85 = vperm.xlu1 %216, %v24_v11   ;;  %75 = vperm.xlu2 %217, %v22_v12  }
  0x13   :  { %141 = vperm.xlu0 %215, %v26_v6  }
  0x61   :  { %v81_v25 = vpop.permute.xlu2 %80 }
  0x69   :  { %v76_v32 = vpop.permute.xlu2 %75 }
  0x75   :  { %v35_v8 = vpop.permute.xlu0 %34 }
  0x79   :  { %v91_v23 = vpop.permute.xlu1 %90 }
  0x7d   :  { %v30_v13 = vpop.permute.xlu0 %29 }
  0x81   :  { %v65_v10 = vpop.f32.mrf.mxu0  ;;  %v86_v27 = vpop.permute.xlu1 %85 }
  0x82   :  { %v66_v15 = vadd.f32 %v65_v10, %v30_v13 }
  0x85   :  { %v142_v40 = vpop.permute.xlu0 %141 }
  0x89   :  { %v68_v14 = vpop.f32.mrf.mxu0 }
  0x8a   :  { %v69_v16 = vadd.f32 %v68_v14, %v35_v8 }
  0x8c   :  { %218 = vtanh.f32 %v69_v16 }
  0x8d   :  { %220 = vtanh.f32 %v66_v15 }
  0x92   :  { %v219_v17 = vpop.eup %218 }
  0x93   :  { %120 = vmatpush.msra.mxu1 %v219_v17  ;;  %211 = vmatpush.msra.mxu3 %v219_v17  ;;  %v221_v20 = vpop.eup %220 }
  0x95   :  { %121 = vmatpush.msra.mxu1 %v221_v20  ;;  %212 = vmatpush.msra.mxu3 %v221_v20 }
  0x96   :  { %208 = vmatmul.msk.f32.vlgmr.msra.gmra.mxu3 %vm93_vm2, %v17_v18  ;;  %206 = vmatmul.msk.f32.vlgmr.msra.gmra.mxu1 %vm93_vm2, %v15_v19 }
  0x9e   :  { %209 = vmatmul.msk.f32.gmra.mxu3 %vm93_vm2, %v18_v21  ;;  %207 = vmatmul.msk.f32.gmra.mxu1 %vm93_vm2, %v16_v22 }
 0x113   :  { %v123_v24 = vpop.f32.mrf.mxu1 }
 0x114   :  { %v124_v34 = vadd.f32 %v123_v24, %v76_v32 }
 0x119   :  { %v129_v26 = vpop.f32.mrf.mxu3 }
 0x11a   :  { %v130_v30 = vadd.f32 %v129_v26, %v86_v27 }
 0x11b   :  { %v126_v28 = vpop.f32.mrf.mxu1 }
 0x11c   :  { %v127_v33 = vadd.f32 %v126_v28, %v81_v25 }
 0x121   :  { %v132_v29 = vpop.f32.mrf.mxu3 }
 0x122   :  { %v133_v31 = vadd.f32 %v132_v29, %v91_v23 }
 0x124   :  { %222 = vtanh.f32 %v133_v31 }
 0x125   :  { %224 = vtanh.f32 %v130_v30 }
 0x126   :  { %226 = vtanh.f32 %v127_v33 }
 0x127   :  { %228 = vtanh.f32 %v124_v34 }
 0x12a   :  { %v223_v35 = vpop.eup %222 }
 0x12b   :  { %160 = vmatpush.msra.mxu2 %v223_v35  ;;  %v225_v36 = vpop.eup %224 }
 0x12c   :  { %v227_v37 = vpop.eup %226 }
 0x12d   :  { %161 = vmatpush.msra.mxu2 %v225_v36  ;;  %v229_v39 = vpop.eup %228 }
 0x12f   :  { %162 = vmatpush.msra.mxu2 %v227_v37 }
 0x131   :  { %163 = vmatpush.msra.mxu2 %v229_v39 }
 0x132   :  { %210 = vmatmul.msk.f32.vlgmr.msra.gmra.mxu2 %vm144_vm3, %v19_v38 }
 0x1b5   :  { %v165_v41 = vpop.f32.mrf.mxu2 }
 0x1b6   :  { %v166_v42 = vadd.f32 %v165_v41, %v142_v40 }
 0x1b8   :  { %v169_v43 = vand.u32 2147483647, %v166_v42  ;;  %184 = vst.msk [vmem:[#allocation2] sm:$0x1] %vm183_vm4, %v166_v42  ;;  %v168_v54 = vmax.f32 %v166_v42, 0.0 }
 0x1ba   :  { %v170_v44 = vsub.f32 0.0, %v169_v43 }
 0x1bc   :  { %v171_v45 = vmul.f32 1.442695, %v170_v44 }
 0x1be   :  { %230 = vpow2.f32 %v171_v45 }
 0x1c4   :  { %v231_v46 = vpop.eup %230 }
 0x1c5   :  { %v173_v47 = vadd.f32 1.0, %v231_v46  ;;  %v176_v48 = vmul.f32 -0.5, %v231_v46  ;;  %v179_v50 = vand.u32 2147483647, %v231_v46 }
 0x1c7   :  { %232 = vlog2.f32 %v173_v47  ;;  %v177_v49 = vadd.f32 1.0, %v176_v48  ;;  %vm180_vm5 = vcmp.lt.f32.partialorder %v179_v50, 0.0004427343 }
 0x1c9   :  { %v178_v53 = vmul.f32 %v231_v46, %v177_v49 }
 0x1cd   :  { %v233_v51 = vpop.eup %232 }
 0x1ce   :  { %v175_v52 = vmul.f32 0.6931472, %v233_v51 }
 0x1d0   :  { %v181_v55 = vsel %vm180_vm5, %v178_v53, %v175_v52 }
 0x1d1   :  { %v182_v56 = vadd.f32 %v181_v55, %v168_v54 }
 0x1d3   :  { %186 = vst.msk [vmem:[#allocation2] sm:$0x2] %vm185_vm6, %v182_v56 }
 0x1d4   :  { %197 = dma.vmem_to_hbm [thread:$0]  %s193_s10, 32, %s195_s13, [#allocation3]  }
 0x1d5   :  { %258 = dma.done.wait [#allocation3], 32  }
 0x1d6   :  { %259 = vsyncadd [#allocation3], 4294967264 }
 0x1d7   :  { %202 = vsyncpa [#allocation3], 1 }

</bundles_post_ra>
